<compile_context>
chip_gen: v7x
topology: tpu7x:2x2x1
jax: 0.10.0
libtpu: 0.0.40
codegen_flags: <defaults>
</compile_context>

<pallas_src>
import jax
import jax.numpy as jnp
from jax.experimental import pallas as pl
from jax.experimental.pallas import tpu as pltpu


def _round_up(x, m):
    return ((x + m - 1) // m) * m


def _vmem_capacity_bytes():
    """Device VMEM capacity; conservative 64 MiB (v7x per-core) fallback."""
    try:
        info = pltpu.get_tpu_info()
        cap = getattr(info, "vmem_capacity_bytes", None)
        if cap:
            return int(cap)
    except Exception:
        pass
    return 64 * 1024 * 1024


def _tile_footprint_bytes(tm, tn, act_p, x_bytes, w_bytes, out_bytes):
    """Approximate VMEM working set for one grid step (double-buffered blocks)."""
    nbuf = 2  # Pallas double-buffers each pipelined block
    f = 0
    f += nbuf * tm * act_p * x_bytes        # x batch tile
    f += nbuf * act_p * tn * w_bytes        # W_enc.T dict tile
    f += nbuf * tn * act_p * w_bytes        # W_dec.T dict tile
    f += nbuf * tn * 4                      # folded encoder bias tile (f32)
    f += nbuf * act_p * 4                   # decoder-side bias row (f32)
    f += nbuf * tm * act_p * out_bytes      # x_hat output tile
    f += nbuf * tm * tn * out_bytes         # feature output tile
    f += tm * act_p * 4                     # f32 accumulator scratch (single)
    return f


def _select_tiles(B, dict_p, act_p, x_bytes, w_bytes, out_bytes,
                  tm_req, tn_req, vmem_budget):
    """Pick (tm, tn, padded batch) so the working set fits the VMEM budget."""
    b_base = _round_up(max(B, 1), 8)
    tm = min(_round_up(tm_req, 8), b_base)

    def best_tn(limit):
        cand = max((min(limit, dict_p) // 128) * 128, 128)
        while cand > 128 and dict_p % cand != 0:
            cand -= 128
        return cand

    tn = best_tn(tn_req)
    while _tile_footprint_bytes(tm, tn, act_p, x_bytes, w_bytes,
                                out_bytes) > vmem_budget:
        if tn > 256:
            tn = best_tn(tn // 2)
        elif tm > 128:
            tm = _round_up(max(128, tm // 2), 8)
        else:
            break
    b_p = _round_up(b_base, tm)
    return tm, tn, b_p


def _vsae_fwd_kernel(x_ref, wenc_ref, benc_ref, bias_ref, wdec_ref,
                     xhat_ref, feat_ref, acc_ref):
    # x_ref:    (tm, act_p)     batch tile (reused across dict tiles)
    # wenc_ref: (act_p, tn)     W_enc.T dict tile
    # benc_ref: (1, tn)         folded encoder bias tile (f32)
    # bias_ref: (1, act_p)      decoder-side bias (f32)
    # wdec_ref: (tn, act_p)     W_dec.T dict tile
    # xhat_ref: (tm, act_p)     output, reduction over the dict axis
    # feat_ref: (tm, tn)        output features for this dict tile
    # acc_ref:  (tm, act_p) f32 VMEM accumulator for the decoder
    n = pl.program_id(1)

    # Initialize the accumulator with the decoder bias (replaces a zero-init
    # store 1:1 and removes a (tm, act_p) add + bias reload on the last step).
    @pl.when(n == 0)
    def _():
        acc_ref[...] = jnp.broadcast_to(bias_ref[...], acc_ref.shape)

    # Encoder (pre-encoder bias subtraction folded into benc by the wrapper).
    # Native-dtype MXU operands, f32 accumulation.
    pre = jnp.dot(x_ref[...], wenc_ref[...],
                  preferred_element_type=jnp.float32) + benc_ref[...]
    mu = jnp.maximum(pre, 0.0)          # ReLU; var_flag=0 -> f = mu
    f = mu.astype(feat_ref.dtype)       # single cast, reused below
    feat_ref[...] = f

    # Decoder partial sum for this dict tile.
    acc_ref[...] += jnp.dot(f.astype(wdec_ref.dtype), wdec_ref[...],
                            preferred_element_type=jnp.float32)

    @pl.when(n == pl.num_programs(1) - 1)
    def _():
        xhat_ref[...] = acc_ref[...].astype(xhat_ref.dtype)


def prepare_vsae_params(enc_w, enc_b, dec_w, bias, *, weight_dtype=None):
    """One-time parameter preparation (do this at init, not per forward call).

    enc_w: [dict, act]  (encoder.weight)
    enc_b: [dict]       (encoder.bias)
    dec_w: [act, dict]  (decoder.weight)
    bias:  [act]        (self.bias)
    weight_dtype: optional storage dtype for the streamed weights (e.g. bf16
                  on v6e/v7x to halve weight HBM bytes); defaults to enc_w.dtype.
    """
    dict_size, act = enc_w.shape
    act_p = _round_up(act, 128)
    dict_p = _round_up(dict_size, 128)
    f32 = jnp.float32
    if weight_dtype is None:
        weight_dtype = enc_w.dtype

    # Fold the pre-encoder bias subtraction into the encoder bias (exact, linear):
    #   (x - bias) @ W_enc.T + b_enc == x @ W_enc.T + (b_enc - bias @ W_enc.T)
    benc_adj = enc_b.astype(f32) - bias.astype(f32) @ enc_w.T.astype(f32)

    wenc_t = enc_w.T.astype(weight_dtype)   # (act, dict)
    wdec_t = dec_w.T.astype(weight_dtype)   # (dict, act)
    if (act_p, dict_p) != (act, dict_size):
        wenc_t = jnp.zeros((act_p, dict_p), weight_dtype).at[:act, :dict_size].set(wenc_t)
        wdec_t = jnp.zeros((dict_p, act_p), weight_dtype).at[:dict_size, :act].set(wdec_t)
        benc2 = jnp.zeros((1, dict_p), f32).at[0, :dict_size].set(benc_adj)
        bias2 = jnp.zeros((1, act_p), f32).at[0, :act].set(bias.astype(f32))
    else:
        benc2 = benc_adj.reshape(1, dict_p)
        bias2 = bias.astype(f32).reshape(1, act_p)

    return dict(wenc_t=wenc_t, benc=benc2, bias=bias2, wdec_t=wdec_t,
                act=act, dict_size=dict_size, act_p=act_p, dict_p=dict_p)


def vsae_multi_gaussian_forward(x, params, *, tm=512, tn=1024):
    """Fused forward of VSAEMultiGaussian (var_flag=0, standard mode).

    x: [B, act].  `params` comes from prepare_vsae_params().
    Returns (x_hat [B, act], f [B, dict]).
    """
    B, act = x.shape
    assert act == params["act"], "activation_dim mismatch"
    act_p, dict_p = params["act_p"], params["dict_p"]
    dict_size = params["dict_size"]

    x_bytes = jnp.dtype(x.dtype).itemsize
    w_bytes = jnp.dtype(params["wenc_t"].dtype).itemsize
    out_bytes = x_bytes

    vmem_cap = _vmem_capacity_bytes()
    vmem_budget = int(vmem_cap * 0.8)
    tm_eff, tn_eff, b_p = _select_tiles(B, dict_p, act_p, x_bytes, w_bytes,
                                        out_bytes, tm, tn, vmem_budget)

    footprint = _tile_footprint_bytes(tm_eff, tn_eff, act_p,
                                      x_bytes, w_bytes, out_bytes)
    vmem_limit = int(min(vmem_cap,
                         max(footprint + footprint // 4 + (2 << 20), 16 << 20)))

    # Pad x only if needed (weights are already padded once at prepare time).
    if (b_p, act_p) != (B, act):
        x_p = jnp.zeros((b_p, act_p), x.dtype).at[:B, :act].set(x)
    else:
        x_p = x

    grid = (b_p // tm_eff, dict_p // tn_eff)
    out_shapes = (
        jax.ShapeDtypeStruct((b_p, act_p), x.dtype),    # x_hat (padded)
        jax.ShapeDtypeStruct((b_p, dict_p), x.dtype),   # features f (padded)
    )
    in_specs = [
        pl.BlockSpec((tm_eff, act_p), lambda i, n: (i, 0)),   # x batch tile
        pl.BlockSpec((act_p, tn_eff), lambda i, n: (0, n)),   # W_enc.T dict tile
        pl.BlockSpec((1, tn_eff), lambda i, n: (0, n)),       # folded b_enc tile
        pl.BlockSpec((1, act_p), lambda i, n: (0, 0)),        # decoder bias
        pl.BlockSpec((tn_eff, act_p), lambda i, n: (n, 0)),   # W_dec.T dict tile
    ]
    out_specs = (
        pl.BlockSpec((tm_eff, act_p), lambda i, n: (i, 0)),   # x_hat (reduce over n)
        pl.BlockSpec((tm_eff, tn_eff), lambda i, n: (i, n)),  # f
    )

    x_hat_p, f_p = pl.pallas_call(
        _vsae_fwd_kernel,
        out_shape=out_shapes,
        grid_spec=pltpu.PrefetchScalarGridSpec(
            num_scalar_prefetch=0,
            grid=grid,
            in_specs=in_specs,
            out_specs=out_specs,
            scratch_shapes=[pltpu.VMEM((tm_eff, act_p), jnp.float32)],
        ),
        compiler_params=pltpu.CompilerParams(
            dimension_semantics=("parallel", "arbitrary"),
            vmem_limit_bytes=vmem_limit),
    )(x_p, params["wenc_t"], params["benc"], params["bias"], params["wdec_t"])

    if (b_p, act_p, dict_p) != (B, act, dict_size):
        return x_hat_p[:B, :act], f_p[:B, :dict_size]
    return x_hat_p, f_p


if __name__ == "__main__":
    activation_dim = 64
    dict_size = 128
    batch = 16

    key = jax.random.PRNGKey(0)
    kx, kw, kb1, kb2 = jax.random.split(key, 4)
    x = jax.random.normal(kx, (batch, activation_dim), dtype=jnp.float32)

    # Mirror the PyTorch __init__ (var_flag=0, use_april_update_mode=False).
    w = jax.random.normal(kw, (activation_dim, dict_size), dtype=jnp.float32)
    w = w / jnp.linalg.norm(w, axis=0, keepdims=True) * 0.1
    enc_w = w.T                                  # encoder.weight [dict, act]
    dec_w = w                                    # decoder.weight [act, dict]
    # Non-trivial biases so the folded-bias path is actually exercised.
    enc_b = 0.01 * jax.random.normal(kb1, (dict_size,), jnp.float32)
    bias = 0.01 * jax.random.normal(kb2, (activation_dim,), jnp.float32)

    params = prepare_vsae_params(enc_w, enc_b, dec_w, bias)   # one-time prep
    x_hat, f = vsae_multi_gaussian_forward(x, params)
    jax.block_until_ready((x_hat, f))

    # Pure-JAX reference of the same forward math.
    mu_ref = jnp.maximum((x - bias) @ enc_w.T + enc_b, 0.0)
    xhat_ref = mu_ref @ dec_w.T + bias
    assert jnp.allclose(x_hat, xhat_ref, atol=1e-4), "x_hat mismatch"
    assert jnp.allclose(f, mu_ref, atol=1e-4), "features mismatch"
    print("KERNEL_OK")
</pallas_src>

<mosaic_0001>
module attributes {stable_mosaic.version = 11 : i64} {
  func.func @_vsae_fwd_kernel(%arg0: i32, %arg1: i32, %arg2: memref<16x128xf32, #tpu.memory_space<vmem>>, %arg3: memref<128x128xf32, #tpu.memory_space<vmem>>, %arg4: memref<1x128xf32, #tpu.memory_space<vmem>>, %arg5: memref<1x128xf32, #tpu.memory_space<vmem>>, %arg6: memref<128x128xf32, #tpu.memory_space<vmem>>, %arg7: memref<16x128xf32, #tpu.memory_space<vmem>>, %arg8: memref<16x128xf32, #tpu.memory_space<vmem>>, %arg9: memref<16x128xf32, #tpu.memory_space<vmem>>) attributes {dimension_semantics = [#tpu.dimension_semantics<parallel>, #tpu.dimension_semantics<arbitrary>], iteration_bounds = array<i64: 1, 1>, scalar_prefetch = 0 : i64, scratch_operands = 1 : i64, tpu.core_type = #tpu.core_type<tc>, window_params = [{transform_indices = @transform_0, window_bounds = array<i64: 16, 128>}, {transform_indices = @transform_1, window_bounds = array<i64: 128, 128>}, {transform_indices = @transform_2, window_bounds = array<i64: 1, 128>}, {pipeline_mode = #tpu.pipeline_mode<synchronous>, transform_indices = @transform_3, window_bounds = array<i64: 1, 128>}, {transform_indices = @transform_4, window_bounds = array<i64: 128, 128>}, {transform_indices = @transform_5, window_bounds = array<i64: 16, 128>}, {transform_indices = @transform_6, window_bounds = array<i64: 16, 128>}]} {
    %c0_i32 = arith.constant 0 : i32
    %0 = arith.cmpi eq, %arg1, %c0_i32 : i32
    %1 = arith.extui %0 : i1 to i32
    %c0_i32_0 = arith.constant 0 : i32
    %2 = arith.cmpi ne, %1, %c0_i32_0 : i32
    scf.if %2 {
      %c0_18 = arith.constant 0 : index
      %c0_19 = arith.constant 0 : index
      %20 = vector.load %arg5[%c0_18, %c0_19] : memref<1x128xf32, #tpu.memory_space<vmem>>, vector<1x128xf32>
      %21 = vector.shape_cast %20 : vector<1x128xf32> to vector<1x128xf32>
      %22 = vector.broadcast %21 : vector<1x128xf32> to vector<16x128xf32>
      %c0_20 = arith.constant 0 : index
      %c0_21 = arith.constant 0 : index
      %23 = vector.load %arg9[%c0_20, %c0_21] : memref<16x128xf32, #tpu.memory_space<vmem>>, vector<16x128xf32>
      tpu.vector_store %arg9[%c0_20, %c0_21], %22 {strides = array<i32>} : memref<16x128xf32, #tpu.memory_space<vmem>>, vector<16x128xf32>,
    } else {
    }
    %c0 = arith.constant 0 : index
    %c0_1 = arith.constant 0 : index
    %3 = vector.load %arg2[%c0, %c0_1] : memref<16x128xf32, #tpu.memory_space<vmem>>, vector<16x128xf32>
    %c0_2 = arith.constant 0 : index
    %c0_3 = arith.constant 0 : index
    %4 = vector.load %arg3[%c0_2, %c0_3] : memref<128x128xf32, #tpu.memory_space<vmem>>, vector<128x128xf32>
    %cst = arith.constant dense<0.000000e+00> : vector<16x128xf32>
    %5 = tpu.matmul %3, %4, %cst {dimension_numbers = #tpu.dot_dimension_numbers<[1], [0], [0], [1], [0, 0, 1, 1], [], []>} : vector<16x128xf32>, vector<128x128xf32>, vector<16x128xf32> -> vector<16x128xf32>
    %c0_4 = arith.constant 0 : index
    %c0_5 = arith.constant 0 : index
    %6 = vector.load %arg4[%c0_4, %c0_5] : memref<1x128xf32, #tpu.memory_space<vmem>>, vector<1x128xf32>
    %7 = vector.broadcast %6 : vector<1x128xf32> to vector<16x128xf32>
    %8 = arith.addf %5, %7 : vector<16x128xf32>
    %cst_6 = arith.constant 0.000000e+00 : f32
    %9 = vector.broadcast %cst_6 : f32 to vector<16x128xf32>
    %10 = arith.maximumf %8, %9 : vector<16x128xf32>
    %c0_7 = arith.constant 0 : index
    %c0_8 = arith.constant 0 : index
    %11 = vector.load %arg8[%c0_7, %c0_8] : memref<16x128xf32, #tpu.memory_space<vmem>>, vector<16x128xf32>
    tpu.vector_store %arg8[%c0_7, %c0_8], %10 {strides = array<i32>} : memref<16x128xf32, #tpu.memory_space<vmem>>, vector<16x128xf32>,
    %c0_9 = arith.constant 0 : index
    %c0_10 = arith.constant 0 : index
    %12 = vector.load %arg9[%c0_9, %c0_10] : memref<16x128xf32, #tpu.memory_space<vmem>>, vector<16x128xf32>
    %c0_11 = arith.constant 0 : index
    %c0_12 = arith.constant 0 : index
    %13 = vector.load %arg6[%c0_11, %c0_12] : memref<128x128xf32, #tpu.memory_space<vmem>>, vector<128x128xf32>
    %cst_13 = arith.constant dense<0.000000e+00> : vector<16x128xf32>
    %14 = tpu.matmul %10, %13, %cst_13 {dimension_numbers = #tpu.dot_dimension_numbers<[1], [0], [0], [1], [0, 0, 1, 1], [], []>} : vector<16x128xf32>, vector<128x128xf32>, vector<16x128xf32> -> vector<16x128xf32>
    %15 = arith.addf %12, %14 : vector<16x128xf32>
    %c0_14 = arith.constant 0 : index
    %c0_15 = arith.constant 0 : index
    %16 = vector.load %arg9[%c0_14, %c0_15] : memref<16x128xf32, #tpu.memory_space<vmem>>, vector<16x128xf32>
    tpu.vector_store %arg9[%c0_14, %c0_15], %15 {strides = array<i32>} : memref<16x128xf32, #tpu.memory_space<vmem>>, vector<16x128xf32>,
    %c0_i32_16 = arith.constant 0 : i32
    %17 = arith.cmpi eq, %arg1, %c0_i32_16 : i32
    %18 = arith.extui %17 : i1 to i32
    %c0_i32_17 = arith.constant 0 : i32
    %19 = arith.cmpi ne, %18, %c0_i32_17 : i32
    scf.if %19 {
      %c0_18 = arith.constant 0 : index
      %c0_19 = arith.constant 0 : index
      %20 = vector.load %arg9[%c0_18, %c0_19] : memref<16x128xf32, #tpu.memory_space<vmem>>, vector<16x128xf32>
      %c0_20 = arith.constant 0 : index
      %c0_21 = arith.constant 0 : index
      %21 = vector.load %arg7[%c0_20, %c0_21] : memref<16x128xf32, #tpu.memory_space<vmem>>, vector<16x128xf32>
      tpu.vector_store %arg7[%c0_20, %c0_21], %20 {strides = array<i32>} : memref<16x128xf32, #tpu.memory_space<vmem>>, vector<16x128xf32>,
    } else {
    }
    return
  }
  func.func @transform_0(%arg0: i32, %arg1: i32) -> (i32, i32) {
    %c0_i32 = arith.constant 0 : i32
    %c0_i32_0 = arith.constant 0 : i32
    return %arg0, %c0_i32 : i32, i32
  }
  func.func @transform_1(%arg0: i32, %arg1: i32) -> (i32, i32) {
    %c0_i32 = arith.constant 0 : i32
    %c0_i32_0 = arith.constant 0 : i32
    return %c0_i32, %arg1 : i32, i32
  }
  func.func @transform_2(%arg0: i32, %arg1: i32) -> (i32, i32) {
    %c0_i32 = arith.constant 0 : i32
    %c0_i32_0 = arith.constant 0 : i32
    return %c0_i32, %arg1 : i32, i32
  }
  func.func @transform_3(%arg0: i32, %arg1: i32) -> (i32, i32) {
    %c0_i32 = arith.constant 0 : i32
    %c0_i32_0 = arith.constant 0 : i32
    %c0_i32_1 = arith.constant 0 : i32
    return %c0_i32, %c0_i32_0 : i32, i32
  }
  func.func @transform_4(%arg0: i32, %arg1: i32) -> (i32, i32) {
    %c0_i32 = arith.constant 0 : i32
    %c0_i32_0 = arith.constant 0 : i32
    return %arg1, %c0_i32 : i32, i32
  }
  func.func @transform_5(%arg0: i32, %arg1: i32) -> (i32, i32) {
    %c0_i32 = arith.constant 0 : i32
    %c0_i32_0 = arith.constant 0 : i32
    return %arg0, %c0_i32 : i32, i32
  }
  func.func @transform_6(%arg0: i32, %arg1: i32) -> (i32, i32) {
    %c0_i32 = arith.constant 0 : i32
    return %arg0, %arg1 : i32, i32
  }
}

</mosaic_0001>

<bundles_post_ra>
// kernel: tpu_custom_call.1
= control target key start
LH: loop header
LB: loop body
LE: loop exit
PB: predicated region body
PF: predicated region fallthrough
CT: control target
= control target key end

     0   :  { %12 = vsyncpa [#allocation4], 0  ;;  %s747_s0 = inlined_call_operand.hbm [shape: f32[16,128], index: 0, kind: input, shape index: {}]   ;;  %s748_s1 = inlined_call_operand.hbm [shape: f32[128,128], index: 1, kind: input, shape index: {}]   ;;  %s749_s2 = inlined_call_operand.vmem [shape: f32[1,128], index: 2, kind: input, shape index: {}]   ;;  %s750_s3 = inlined_call_operand.vmem [shape: f32[1,128], index: 3, kind: input, shape index: {}]   ;;  %s751_s4 = inlined_call_operand.hbm [shape: f32[128,128], index: 4, kind: input, shape index: {}]   ;;  %s752_s5 = inlined_call_operand.hbm [shape: f32[16,128], index: 5, kind: output, shape index: {0}]   ;;  %s753_s6 = inlined_call_operand.hbm [shape: f32[16,128], index: 6, kind: output, shape index: {1}]  }
   0x1   :  { %13 = vsyncpa [#allocation7], 0 }
   0x2   :  { %14 = vsyncpa [#allocation5], 0 }
   0x3   :  { %15 = vsyncpa [#allocation11], 0  ;;  %s617_s21 = smov [#allocation6]   ;;  %s618_s23 = smov [#allocation3]  }
   0x4   :  { %s33_s22 = sshll.u32 %s617_s21, 4  ;;  %s21_s24 = sshll.u32 %s618_s23, 4  ;;  %s34_s22 = int_to_ptr.vmem [resolvable:$true] %s33_s22  ;;  %s659_s24 = int_to_ptr.vmem [resolvable:$true] %s21_s24 }
   0x5   :  { %s499_s27 = scalar_lea.hbm %s748_s1, 2048 }
   0x6   :  { %p500_p0 = scmp.ne.s32.totalorder %s748_s1, %s499_s27  ;;  %p503_p1 = scmp.lt.u32.totalorder %s499_s27, %s748_s1 }
   0x8   :  { %p505_p2 = pnand %p503_p1, %p500_p0 }
   0xa   :  { %508 = shalt.err (!%p505_p2)
}
   0xb   :  { %s509_s8 = scalar_lea.vmem %s34_s22, 2048  ;;  %p514_p4 = scmp.lt.s32.totalorder %s34_s22, %s34_s22 }
   0xc   :  { %p510_p3 = scmp.ne.s32.totalorder %s34_s22, %s509_s8  ;;  %p515_p5 = scmp.lt.s32.totalorder %s509_s8, %s509_s8 }
   0xe   :  { %p516_p6 = por %p515_p5, %p514_p4 }
  0x10   :  { %p517_p7 = pnand %p516_p6, %p510_p3 }
  0x12   :  { %520 = shalt.err (!%p517_p7)
}
  0x13   :  { %s619_s9 = smov 128   ;;  %s620_s10 = smov 8  }
  0x14   :  { %39 = dma.hbm_to_vmem [thread:$0]  %s748_s1, 2048, %s34_s22, [#allocation7], %s619_s9, %s619_s9, %s620_s10  }
  0x15   :  { %s521_s15 = scalar_lea.hbm %s747_s0, 256 }
  0x16   :  { %p522_p8 = scmp.ne.s32.totalorder %s747_s0, %s521_s15  ;;  %p525_p9 = scmp.lt.u32.totalorder %s521_s15, %s747_s0 }
  0x18   :  { %p527_p10 = pnand %p525_p9, %p522_p8 }
  0x1a   :  { %530 = shalt.err (!%p527_p10)
}
  0x1b   :  { %s531_s20 = scalar_lea.vmem %s659_s24, 256  ;;  %p536_p12 = scmp.lt.s32.totalorder %s659_s24, %s659_s24 }
  0x1c   :  { %p532_p11 = scmp.ne.s32.totalorder %s659_s24, %s531_s20  ;;  %p537_p13 = scmp.lt.s32.totalorder %s531_s20, %s531_s20 }
  0x1e   :  { %p538_p0 = por %p537_p13, %p536_p12 }
  0x20   :  { %p539_p1 = pnand %p538_p0, %p532_p11 }
  0x22   :  { %542 = shalt.err (!%p539_p1)
}
  0x23   :  { %27 = dma.hbm_to_vmem [thread:$0]  %s747_s0, 256, %s659_s24, [#allocation4], %s619_s9, %s619_s9, %s620_s10  }
  0x24   :  { %s621_s22 = smov [#allocation8]   ;;  %s543_s27 = scalar_lea.hbm %s751_s4, 2048 }
  0x25   :  { %s49_s23 = sshll.u32 %s621_s22, 4  ;;  %p544_p2 = scmp.ne.s32.totalorder %s751_s4, %s543_s27  ;;  %s50_s23 = int_to_ptr.vmem [resolvable:$true] %s49_s23 }
  0x26   :  { %p547_p3 = scmp.lt.u32.totalorder %s543_s27, %s751_s4 }
  0x28   :  { %p549_p4 = pnand %p547_p3, %p544_p2 }
  0x2a   :  { %552 = shalt.err (!%p549_p4)
}
  0x2b   :  { %s553_s8 = scalar_lea.vmem %s50_s23, 2048  ;;  %p558_p6 = scmp.lt.s32.totalorder %s50_s23, %s50_s23 }
  0x2c   :  { %p554_p5 = scmp.ne.s32.totalorder %s50_s23, %s553_s8  ;;  %p559_p7 = scmp.lt.s32.totalorder %s553_s8, %s553_s8 }
  0x2e   :  { %p560_p8 = por %p559_p7, %p558_p6 }
  0x30   :  { %p561_p9 = pnand %p560_p8, %p554_p5 }
  0x32   :  { %564 = shalt.err (!%p561_p9)
}
  0x33   :  { %55 = dma.hbm_to_vmem [thread:$0]  %s751_s4, 2048, %s50_s23, [#allocation7], %s619_s9, %s619_s9, %s620_s10  }
  0x34   :  { %609 = dma.done.wait [#allocation4], 256  }
  0x35   :  { %610 = vsyncadd [#allocation4], 4294967040 }
  0x36   :  { %611 = dma.done.wait [#allocation7], 4096  }
  0x37   :  { %612 = vsyncadd [#allocation7], 4294963200  ;;  %v80_v0 = vld [vmem:[#allocation6] sm:$0xff]  ;;  %v81_v1 = vld [vmem:[#allocation6 + $0x8] sm:$0xff]  ;;  %s622_s12 = smov [#allocation10]  }
  0x38   :  { %v82_v2 = vld [vmem:[#allocation6 + $0x10] sm:$0xff]  ;;  %v428_v3 = vpack.c.bf16 %v81_v1, %v80_v0  ;;  %v83_v4 = vld [vmem:[#allocation6 + $0x18] sm:$0xff]  ;;  %v84_v6 = vld [vmem:[#allocation6 + $0x20] sm:$0xff]  ;;  %s303_s13 = sshll.u32 %s622_s12, 4  ;;  %s304_s13 = int_to_ptr.vmem [resolvable:$true] %s303_s13 }
  0x39   :  { %v432_v5 = vpack.c.bf16 %v83_v4, %v82_v2  ;;  %v85_v7 = vld [vmem:[#allocation6 + $0x28] sm:$0xff]  ;;  %v86_v9 = vld [vmem:[#allocation6 + $0x30] sm:$0xff]  ;;  %v87_v10 = vld [vmem:[#allocation6 + $0x38] sm:$0xff]  ;;  %s565_s14 = scalar_lea.vmem %s304_s13, 256  ;;  %p570_p11 = scmp.lt.s32.totalorder %s304_s13, %s304_s13 }
  0x3a   :  { %429 = vmatprep.subr.bf16.mxu0 %v428_v3  ;;  %v436_v8 = vpack.c.bf16 %v85_v7, %v84_v6  ;;  %v78_v11 = vld [vmem:[#allocation3] sm:$0xff]  ;;  %v184_v12 = vld [vmem:[#allocation8] sm:$0xff]  ;;  %v185_v13 = vld [vmem:[#allocation8 + $0x8] sm:$0xff]  ;;  %v440_v20 = vpack.c.bf16 %v87_v10, %v86_v9  ;;  %p566_p10 = scmp.ne.s32.totalorder %s304_s13, %s565_s14  ;;  %p571_p12 = scmp.lt.s32.totalorder %s565_s14, %s565_s14 }
  0x3b   :  { %431 = vmatpush3.bf16.msra.mxu0 %v428_v3  ;;  %390 = vmatprep.mubr.f32.mxu0 %v78_v11  ;;  %v186_v14 = vld [vmem:[#allocation8 + $0x10] sm:$0xff]  ;;  %v460_v15 = vpack.c.bf16 %v185_v13, %v184_v12  ;;  %v187_v16 = vld [vmem:[#allocation8 + $0x18] sm:$0xff]  ;;  %v188_v18 = vld [vmem:[#allocation8 + $0x20] sm:$0xff] }
  0x3c   :  { %433 = vmatprep.subr.bf16.mxu0 %v432_v5  ;;  %v464_v17 = vpack.c.bf16 %v187_v16, %v186_v14  ;;  %v189_v19 = vld [vmem:[#allocation8 + $0x28] sm:$0xff]  ;;  %v88_v21 = vld [vmem:[#allocation6 + $0x40] sm:$0xff]  ;;  %v190_v24 = vld [vmem:[#allocation8 + $0x30] sm:$0xff]  ;;  %p572_p13 = por %p571_p12, %p570_p11 }
  0x3d   :  { %461 = vmatprep.subr.bf16.mxu1 %v460_v15  ;;  %v89_v22 = vld [vmem:[#allocation6 + $0x48] sm:$0xff]  ;;  %v468_v23 = vpack.c.bf16 %v189_v19, %v188_v18  ;;  %v191_v25 = vld [vmem:[#allocation8 + $0x38] sm:$0xff]  ;;  %v90_v27 = vld [vmem:[#allocation6 + $0x50] sm:$0xff] }
  0x3e   :  { %463 = vmatpush3.bf16.msra.mxu1 %v460_v15  ;;  %v444_v26 = vpack.c.bf16 %v89_v22, %v88_v21  ;;  %v91_v28 = vld [vmem:[#allocation6 + $0x58] sm:$0xff]  ;;  %v472_v29 = vpack.c.bf16 %v191_v25, %v190_v24  ;;  %v192_v30 = vld [vmem:[#allocation8 + $0x40] sm:$0xff]  ;;  %v193_v31 = vld [vmem:[#allocation8 + $0x48] sm:$0xff]  ;;  %p573_p0 = pnand %p572_p13, %p566_p10 }
  0x3f   :  { %435 = vmatpush3.bf16.msra.mxu0 %v432_v5  ;;  %465 = vmatprep.subr.bf16.mxu1 %v464_v17  ;;  %v448_v32 = vpack.c.bf16 %v91_v28, %v90_v27  ;;  %v92_v33 = vld [vmem:[#allocation6 + $0x60] sm:$0xff]  ;;  %v93_v34 = vld [vmem:[#allocation6 + $0x68] sm:$0xff]  ;;  %v476_v35 = vpack.c.bf16 %v193_v31, %v192_v30  ;;  %v194_v36 = vld [vmem:[#allocation8 + $0x50] sm:$0xff] }
  0x40   :  { %437 = vmatprep.subr.bf16.mxu0 %v436_v8  ;;  %v195_v37 = vld [vmem:[#allocation8 + $0x58] sm:$0xff]  ;;  %v452_v38 = vpack.c.bf16 %v93_v34, %v92_v33  ;;  %v94_v39 = vld [vmem:[#allocation6 + $0x70] sm:$0xff]  ;;  %v196_v42 = vld [vmem:[#allocation8 + $0x60] sm:$0xff] }
  0x41   :  { %v95_v40 = vld [vmem:[#allocation6 + $0x78] sm:$0xff]  ;;  %v480_v41 = vpack.c.bf16 %v195_v37, %v194_v36  ;;  %v197_v43 = vld [vmem:[#allocation8 + $0x68] sm:$0xff]  ;;  %v198_v47 = vld [vmem:[#allocation8 + $0x70] sm:$0xff] }
  0x42   :  { %467 = vmatpush3.bf16.msra.mxu1 %v464_v17  ;;  %v456_v44 = vpack.c.bf16 %v95_v40, %v94_v39  ;;  %v484_v45 = vpack.c.bf16 %v197_v43, %v196_v42  ;;  %v79_v46 = vld [vmem:[#allocation3 + $0x8] sm:$0xff]  ;;  %v321_v50 = vld [vmem:[%s749_s2] ss:$0 sm:$0xff] }
  0x43   :  { %439 = vmatpush3.bf16.msra.mxu0 %v436_v8  ;;  %469 = vmatprep.subr.bf16.mxu1 %v468_v23  ;;  %v199_v48 = vld [vmem:[#allocation8 + $0x78] sm:$0xff] }
  0x44   :  { %441 = vmatprep.subr.bf16.mxu0 %v440_v20  ;;  %v488_v49 = vpack.c.bf16 %v199_v48, %v198_v47 }
  0x46   :  { %471 = vmatpush3.bf16.msra.mxu1 %v468_v23 }
  0x47   :  { %443 = vmatpush3.bf16.msra.mxu0 %v440_v20  ;;  %473 = vmatprep.subr.bf16.mxu1 %v472_v29 }
  0x48   :  { %445 = vmatprep.subr.bf16.mxu0 %v444_v26 }
  0x4a   :  { %475 = vmatpush3.bf16.msra.mxu1 %v472_v29 }
  0x4b   :  { %447 = vmatpush3.bf16.msra.mxu0 %v444_v26  ;;  %477 = vmatprep.subr.bf16.mxu1 %v476_v35 }
  0x4c   :  { %449 = vmatprep.subr.bf16.mxu0 %v448_v32 }
  0x4e   :  { %479 = vmatpush3.bf16.msra.mxu1 %v476_v35 }
  0x4f   :  { %451 = vmatpush3.bf16.msra.mxu0 %v448_v32  ;;  %481 = vmatprep.subr.bf16.mxu1 %v480_v41 }
  0x50   :  { %453 = vmatprep.subr.bf16.mxu0 %v452_v38 }
  0x52   :  { %483 = vmatpush3.bf16.msra.mxu1 %v480_v41 }
  0x53   :  { %455 = vmatpush3.bf16.msra.mxu0 %v452_v38  ;;  %485 = vmatprep.subr.bf16.mxu1 %v484_v45 }
  0x54   :  { %457 = vmatprep.subr.bf16.mxu0 %v456_v44 }
  0x56   :  { %487 = vmatpush3.bf16.msra.mxu1 %v484_v45 }
  0x57   :  { %459 = vmatpush3.bf16.msra.mxu0 %v456_v44  ;;  %489 = vmatprep.subr.bf16.mxu1 %v488_v49 }
  0x5a   :  { %391 = vmatmul.mubr.f32.vlgmr.msra.gmra.mrb[0].mxu0 %v79_v46  ;;  %491 = vmatpush3.bf16.msra.mxu1 %v488_v49 }
 0x12d   :  { %v392_v51 = vpop.f32.mrb[0].mxu0 }
 0x12e   :  { %v175_v52 = vadd.f32 %v392_v51, %v321_v50  ;;  %v169_v53 = vpop.f32.mrb[1].mxu0 }
 0x12f   :  { %v170_v54 = vadd.f32 %v321_v50, %v169_v53 }
 0x130   :  { %v179_v55 = vmax.f32 %v175_v52, 0.0 }
 0x131   :  { %v178_v56 = vmax.f32 %v170_v54, 0.0 }
 0x132   :  { %181 = vst [vmem:[#allocation10 + $0x8] sm:$0xff] %v179_v55 }
 0x133   :  { %180 = vst [vmem:[#allocation10] sm:$0xff] %v178_v56  ;;  %425 = vmatprep.mubr.f32.mxu1 %v178_v56 }
 0x134   :  { %426 = vmatmul.mubr.f32.vlgmr.msra.gmra.mrb[0].mxu1 %v179_v55 }
 0x135   :  { %576 = shalt.err (!%p573_p0)
}
 0x136   :  { %s577_s16 = scalar_lea.hbm %s753_s6, 256 }
 0x137   :  { %p578_p1 = scmp.ne.s32.totalorder %s753_s6, %s577_s16  ;;  %p581_p2 = scmp.lt.u32.totalorder %s577_s16, %s753_s6 }
 0x139   :  { %p583_p3 = pnand %p581_p2, %p578_p1 }
 0x13b   :  { %586 = shalt.err (!%p583_p3)
}
 0x13c   :  { %309 = dma.vmem_to_hbm [thread:$0]  %s304_s13, 256, %s753_s6, [#allocation11], %s619_s9, %s619_s9, %s620_s10  }
 0x13d   :  { %v320_v57 = vld [vmem:[%s750_s3] ss:$0 sm:$0xff]  ;;  %s623_s25 = smov [#allocation9]  }
 0x13e   :  { %s291_s26 = sshll.u32 %s623_s25, 4  ;;  %s292_s26 = int_to_ptr.vmem [resolvable:$true] %s291_s26 }
 0x13f   :  { %s587_s27 = scalar_lea.vmem %s292_s26, 256  ;;  %p592_p5 = scmp.lt.s32.totalorder %s292_s26, %s292_s26 }
 0x140   :  { %p588_p4 = scmp.ne.s32.totalorder %s292_s26, %s587_s27  ;;  %p593_p6 = scmp.lt.s32.totalorder %s587_s27, %s587_s27 }
 0x142   :  { %p594_p7 = por %p593_p6, %p592_p5 }
 0x144   :  { %p595_p8 = pnand %p594_p7, %p588_p4 }
 0x207   :  { %v427_v58 = vpop.f32.mrb[0].mxu1 }
 0x208   :  { %v276_v59 = vadd.f32 %v427_v58, %v320_v57  ;;  %v266_v60 = vpop.f32.mrb[1].mxu1 }
 0x209   :  { %v275_v61 = vadd.f32 %v320_v57, %v266_v60 }
 0x20a   :  { %285 = vst [vmem:[#allocation9 + $0x8] sm:$0xff] %v276_v59 }
 0x20b   :  { %284 = vst [vmem:[#allocation9] sm:$0xff] %v275_v61 }
 0x20c   :  { %598 = shalt.err (!%p595_p8)
}
 0x20d   :  { %s599_s3 = scalar_lea.hbm %s752_s5, 256 }
 0x20e   :  { %p600_p9 = scmp.ne.s32.totalorder %s752_s5, %s599_s3  ;;  %p603_p10 = scmp.lt.u32.totalorder %s599_s3, %s752_s5 }
 0x210   :  { %p605_p11 = pnand %p603_p10, %p600_p9 }
 0x212   :  { %608 = shalt.err (!%p605_p11)
}
 0x213   :  { %297 = dma.vmem_to_hbm [thread:$0]  %s292_s26, 256, %s752_s5, [#allocation5], %s619_s9, %s619_s9, %s620_s10  }
 0x214   :  { %613 = dma.done.wait [#allocation5], 256  }
 0x215   :  { %614 = vsyncadd [#allocation5], 4294967040 }
 0x216   :  { %615 = dma.done.wait [#allocation11], 256  }
 0x217   :  { %616 = vsyncadd [#allocation11], 4294967040 }
 0x218   :  { %316 = vsyncpa [#allocation4], 1 }
 0x219   :  { %317 = vsyncpa [#allocation7], 1 }
 0x21a   :  { %318 = vsyncpa [#allocation5], 1 }
 0x21b   :  { %319 = vsyncpa [#allocation11], 1 }

</bundles_post_ra>
